<compile_context>
chip_gen: v7x
topology: tpu7x:2x2x1
jax: 0.10.0
libtpu: 0.0.40
codegen_flags: <defaults>
</compile_context>

<pallas_src>
import functools

import jax
import jax.numpy as jnp
from jax.experimental import pallas as pl
from jax.experimental.pallas import tpu as pltpu


def _cdiv(a, b):
    return -(-a // b)


def _round_up(a, b):
    return _cdiv(a, b) * b


def actor_forward_kernel(x_ref, w_ref, b_ref, mu_ref, sg_ref,
                         *, in_p, c, n_actions):
    """Fused MLP forward for one batch tile (all weights resident in VMEM).

    Weight slab layout (rows):   [W1p (in_p, C)] [W2p (C, C)] [Whp (C, C)]
    Bias  slab layout (lanes):   [b1p (C)] [b2p (C)] [bhp (C)]
    Padded columns of the hidden activations are exactly 0 (zero weights,
    zero bias, ReLU), so the padded matmuls are numerically identical to the
    unpadded MLP.
    """
    x = x_ref[...]                                   # (tb, in_p) bf16

    w1 = w_ref[:in_p, :]                             # (in_p, C) bf16
    w2 = w_ref[in_p:in_p + c, :]                     # (C, C)    bf16
    wh = w_ref[in_p + c:, :]                         # (C, C)    bf16
    b1 = b_ref[:, :c]                                # (1, C)    f32
    b2 = b_ref[:, c:2 * c]
    bh = b_ref[:, 2 * c:]

    h = jnp.dot(x, w1, preferred_element_type=jnp.float32) + b1
    h = jnp.maximum(h, 0.0)                          # ReLU (f32, VPU)

    h = jnp.dot(h.astype(jnp.bfloat16), w2,
                preferred_element_type=jnp.float32) + b2
    h = jnp.maximum(h, 0.0)                          # ReLU (f32, VPU)

    # Fused head matmul (mu | sigma packed side by side, zero-padded to C).
    y = jnp.dot(h.astype(jnp.bfloat16), wh,
                preferred_element_type=jnp.float32) + bh

    mu_ref[...] = y[:, :n_actions]
    sg_ref[...] = jnp.clip(y[:, n_actions:2 * n_actions], 1e-6, 1.0)


def actor_forward(state, params, *, tile_batch=512):
    """Batch-tiled pallas_call wrapper; returns (mu, sigma) like the module.

    tile_batch only caps the tile size; for batch >= 16 the grid is forced to
    an even number of steps so both v7x TensorCores get work. (On v7x with
    very large eval batches, raising tile_batch to 1024 keeps the per-step
    overhead amortized.)
    """
    (w1, b1), (w2, b2), (wmu, bmu), (wsg, bsg) = params

    batch, in_dim = state.shape
    h1 = w1.shape[1]
    h2 = w2.shape[1]
    n_actions = wmu.shape[1]

    # --- pack all weights/biases into two resident slabs ----------------------
    c = _round_up(max(h1, h2, 2 * n_actions), 128)   # lane width of every layer
    in_p = _round_up(in_dim, 8)                      # sublane-aligned input dim

    w1p = jnp.pad(w1, ((0, in_p - in_dim), (0, c - h1)))
    w2p = jnp.pad(w2, ((0, c - h1), (0, c - h2)))
    whp = jnp.pad(jnp.concatenate([wmu, wsg], axis=1),
                  ((0, c - h2), (0, c - 2 * n_actions)))
    w_slab = jnp.concatenate([w1p, w2p, whp], axis=0).astype(jnp.bfloat16)

    b1p = jnp.pad(b1, ((0, 0), (0, c - h1)))
    b2p = jnp.pad(b2, ((0, 0), (0, c - h2)))
    bhp = jnp.pad(jnp.concatenate([bmu, bsg], axis=1),
                  ((0, 0), (0, c - 2 * n_actions)))
    b_slab = jnp.concatenate([b1p, b2p, bhp], axis=1)          # (1, 3C) f32

    # --- batch tiling: >=2 (even) grid steps when batch allows ----------------
    n_tiles = _cdiv(batch, tile_batch)
    if batch >= 16:
        n_tiles = max(n_tiles, 2)
        n_tiles = _round_up(n_tiles, 2)              # even -> clean 2-TC split
    tb = _round_up(_cdiv(batch, n_tiles), 8)
    pb = tb * n_tiles
    grid = (n_tiles,)

    # bf16 input (halves input DMA bytes; first matmul rounds to bf16 anyway).
    x = state.astype(jnp.bfloat16)
    if pb != batch or in_p != in_dim:
        x = jnp.pad(x, ((0, pb - batch), (0, in_p - in_dim)))

    # --- specs: batch-tiled activations, resident weight/bias slabs -----------
    x_spec = pl.BlockSpec((tb, in_p), lambda i: (i, 0))
    w_spec = pl.BlockSpec(w_slab.shape, lambda i: (0, 0))
    b_spec = pl.BlockSpec(b_slab.shape, lambda i: (0, 0))
    out_spec = pl.BlockSpec((tb, n_actions), lambda i: (i, 0))

    flops = 2 * pb * (in_dim * h1 + h1 * h2 + h2 * 2 * n_actions)
    bytes_accessed = (pb * in_p * 2                      # bf16 input
                      + 2 * pb * n_actions * 4           # f32 mu + sigma
                      + w_slab.size * 2 + b_slab.size * 4)

    mu, sigma = pl.pallas_call(
        functools.partial(actor_forward_kernel,
                          in_p=in_p, c=c, n_actions=n_actions),
        out_shape=(jax.ShapeDtypeStruct((pb, n_actions), jnp.float32),
                   jax.ShapeDtypeStruct((pb, n_actions), jnp.float32)),
        grid=grid,
        in_specs=[x_spec, w_spec, b_spec],
        out_specs=(out_spec, out_spec),
        compiler_params=pltpu.CompilerParams(
            dimension_semantics=("parallel",)),
        cost_estimate=pl.CostEstimate(
            flops=flops, transcendentals=0, bytes_accessed=bytes_accessed),
    )(x, w_slab, b_slab)

    if pb != batch:
        mu = mu[:batch]
        sigma = sigma[:batch]
    return mu, sigma


def init_linear(key, fan_in, fan_out):
    """Deterministic init mimicking PyTorch nn.Linear (uniform +/- 1/sqrt(fan_in)).

    Weight returned pre-transposed to (fan_in, fan_out); bias as (1, fan_out).
    """
    kw, kb = jax.random.split(key)
    bound = 1.0 / jnp.sqrt(jnp.float32(fan_in))
    w = jax.random.uniform(kw, (fan_in, fan_out), jnp.float32, -bound, bound)
    b = jax.random.uniform(kb, (1, fan_out), jnp.float32, -bound, bound)
    return w, b


def reference_forward(state, params):
    """Pure-JAX reference mirroring the kernel's bf16-operand / f32-accum math."""
    (w1, b1), (w2, b2), (wmu, bmu), (wsg, bsg) = params
    xb = state.astype(jnp.bfloat16)
    h = jnp.dot(xb, w1.astype(jnp.bfloat16),
                preferred_element_type=jnp.float32) + b1
    h = jnp.maximum(h, 0.0)
    h = jnp.dot(h.astype(jnp.bfloat16), w2.astype(jnp.bfloat16),
                preferred_element_type=jnp.float32) + b2
    h = jnp.maximum(h, 0.0)
    hb = h.astype(jnp.bfloat16)
    mu = jnp.dot(hb, wmu.astype(jnp.bfloat16),
                 preferred_element_type=jnp.float32) + bmu
    sg = jnp.dot(hb, wsg.astype(jnp.bfloat16),
                 preferred_element_type=jnp.float32) + bsg
    return mu, jnp.clip(sg, 1e-6, 1.0)


if __name__ == "__main__":
    # Small shapes consistent with the module's __init__:
    #   input_dims = (8,), fc_dims = [32, 32], n_actions = 4, batch = 8
    # TODO(synk): sample_normal (Normal rsample + tanh squash + log-prob),
    # optimizer and checkpoint I/O are not part of the forward kernel.
    batch = 8
    input_dim = 8
    fc_dims = (32, 32)
    n_actions = 4

    key = jax.random.PRNGKey(0)
    k_state, k1, k2, k3, k4, k_big = jax.random.split(key, 6)

    state = jax.random.normal(k_state, (batch, input_dim), jnp.float32)

    params = (
        init_linear(k1, input_dim, fc_dims[0]),   # fc1
        init_linear(k2, fc_dims[0], fc_dims[1]),  # fc2
        init_linear(k3, fc_dims[1], n_actions),   # mu head
        init_linear(k4, fc_dims[1], n_actions),   # sigma head
    )

    # Single-tile path (grid=1, no padding).
    mu, sigma = actor_forward(state, params)
    jax.block_until_ready((mu, sigma))

    mu_ref, sigma_ref = reference_forward(state, params)
    assert mu.shape == (batch, n_actions) and sigma.shape == (batch, n_actions)
    assert jnp.allclose(mu, mu_ref, atol=2e-3, rtol=2e-3), "mu mismatch"
    assert jnp.allclose(sigma, sigma_ref, atol=2e-3, rtol=2e-3), "sigma mismatch"
    assert jnp.all(sigma >= 1e-6) and jnp.all(sigma <= 1.0)

    # Multi-tile path (grid=2, row padding) exercising the v7x 2-TC split.
    state_big = jax.random.normal(k_big, (100, input_dim), jnp.float32)
    mu_b, sigma_b = actor_forward(state_big, params)
    jax.block_until_ready((mu_b, sigma_b))
    mu_rb, sigma_rb = reference_forward(state_big, params)
    assert mu_b.shape == (100, n_actions) and sigma_b.shape == (100, n_actions)
    assert jnp.allclose(mu_b, mu_rb, atol=2e-3, rtol=2e-3), "mu (big) mismatch"
    assert jnp.allclose(sigma_b, sigma_rb, atol=2e-3, rtol=2e-3), "sigma (big) mismatch"
    assert jnp.all(sigma_b >= 1e-6) and jnp.all(sigma_b <= 1.0)

    print("KERNEL_OK")
</pallas_src>

<mosaic_0001>
module attributes {stable_mosaic.version = 11 : i64} {
  func.func @actor_forward_kernel(%arg0: i32, %arg1: memref<8x8xbf16, #tpu.memory_space<vmem>>, %arg2: memref<264x128xbf16, #tpu.memory_space<vmem>>, %arg3: memref<1x384xf32, #tpu.memory_space<vmem>>, %arg4: memref<8x4xf32, #tpu.memory_space<vmem>>, %arg5: memref<8x4xf32, #tpu.memory_space<vmem>>) attributes {dimension_semantics = [#tpu.dimension_semantics<parallel>], iteration_bounds = array<i64: 1>, scalar_prefetch = 0 : i64, scratch_operands = 0 : i64, tpu.core_type = #tpu.core_type<tc>, window_params = [{transform_indices = @transform_0, window_bounds = array<i64: 8, 8>}, {pipeline_mode = #tpu.pipeline_mode<synchronous>, transform_indices = @transform_1, window_bounds = array<i64: 264, 128>}, {pipeline_mode = #tpu.pipeline_mode<synchronous>, transform_indices = @transform_2, window_bounds = array<i64: 1, 384>}, {transform_indices = @transform_3, window_bounds = array<i64: 8, 4>}, {transform_indices = @transform_4, window_bounds = array<i64: 8, 4>}]} {
    %c0 = arith.constant 0 : index
    %c0_0 = arith.constant 0 : index
    %0 = vector.load %arg1[%c0, %c0_0] : memref<8x8xbf16, #tpu.memory_space<vmem>>, vector<8x8xbf16>
    %c0_1 = arith.constant 0 : index
    %c0_2 = arith.constant 0 : index
    %1 = vector.load %arg2[%c0_1, %c0_2] : memref<264x128xbf16, #tpu.memory_space<vmem>>, vector<8x128xbf16>
    %c8 = arith.constant 8 : index
    %c0_3 = arith.constant 0 : index
    %2 = vector.load %arg2[%c8, %c0_3] : memref<264x128xbf16, #tpu.memory_space<vmem>>, vector<128x128xbf16>
    %c136 = arith.constant 136 : index
    %c0_4 = arith.constant 0 : index
    %3 = vector.load %arg2[%c136, %c0_4] : memref<264x128xbf16, #tpu.memory_space<vmem>>, vector<128x128xbf16>
    %c0_5 = arith.constant 0 : index
    %c0_6 = arith.constant 0 : index
    %4 = vector.load %arg3[%c0_5, %c0_6] : memref<1x384xf32, #tpu.memory_space<vmem>>, vector<1x128xf32>
    %c0_7 = arith.constant 0 : index
    %c128 = arith.constant 128 : index
    %5 = vector.load %arg3[%c0_7, %c128] : memref<1x384xf32, #tpu.memory_space<vmem>>, vector<1x128xf32>
    %c0_8 = arith.constant 0 : index
    %c256 = arith.constant 256 : index
    %6 = vector.load %arg3[%c0_8, %c256] : memref<1x384xf32, #tpu.memory_space<vmem>>, vector<1x128xf32>
    %cst = arith.constant dense<0.000000e+00> : vector<8x128xf32>
    %7 = tpu.matmul %0, %1, %cst {dimension_numbers = #tpu.dot_dimension_numbers<[1], [0], [0], [1], [0, 0, 1, 1], [], []>} : vector<8x8xbf16>, vector<8x128xbf16>, vector<8x128xf32> -> vector<8x128xf32>
    %8 = vector.broadcast %4 : vector<1x128xf32> to vector<8x128xf32>
    %9 = arith.addf %7, %8 : vector<8x128xf32>
    %cst_9 = arith.constant 0.000000e+00 : f32
    %10 = vector.broadcast %cst_9 : f32 to vector<8x128xf32>
    %11 = arith.maximumf %9, %10 : vector<8x128xf32>
    %12 = arith.truncf %11 : vector<8x128xf32> to vector<8x128xbf16>
    %cst_10 = arith.constant dense<0.000000e+00> : vector<8x128xf32>
    %13 = tpu.matmul %12, %2, %cst_10 {dimension_numbers = #tpu.dot_dimension_numbers<[1], [0], [0], [1], [0, 0, 1, 1], [], []>} : vector<8x128xbf16>, vector<128x128xbf16>, vector<8x128xf32> -> vector<8x128xf32>
    %14 = vector.broadcast %5 : vector<1x128xf32> to vector<8x128xf32>
    %15 = arith.addf %13, %14 : vector<8x128xf32>
    %cst_11 = arith.constant 0.000000e+00 : f32
    %16 = vector.broadcast %cst_11 : f32 to vector<8x128xf32>
    %17 = arith.maximumf %15, %16 : vector<8x128xf32>
    %18 = arith.truncf %17 : vector<8x128xf32> to vector<8x128xbf16>
    %cst_12 = arith.constant dense<0.000000e+00> : vector<8x128xf32>
    %19 = tpu.matmul %18, %3, %cst_12 {dimension_numbers = #tpu.dot_dimension_numbers<[1], [0], [0], [1], [0, 0, 1, 1], [], []>} : vector<8x128xbf16>, vector<128x128xbf16>, vector<8x128xf32> -> vector<8x128xf32>
    %20 = vector.broadcast %6 : vector<1x128xf32> to vector<8x128xf32>
    %21 = arith.addf %19, %20 : vector<8x128xf32>
    %22 = vector.extract_strided_slice %21 {offsets = [0, 0], sizes = [8, 4], strides = [1, 1]} : vector<8x128xf32> to vector<8x4xf32>
    %c0_13 = arith.constant 0 : index
    %c0_14 = arith.constant 0 : index
    %23 = vector.load %arg4[%c0_13, %c0_14] : memref<8x4xf32, #tpu.memory_space<vmem>>, vector<8x4xf32>
    tpu.vector_store %arg4[%c0_13, %c0_14], %22 {strides = array<i32>} : memref<8x4xf32, #tpu.memory_space<vmem>>, vector<8x4xf32>,
    %24 = vector.extract_strided_slice %21 {offsets = [0, 4], sizes = [8, 4], strides = [1, 1]} : vector<8x128xf32> to vector<8x4xf32>
    %cst_15 = arith.constant 9.99999997E-7 : f32
    %cst_16 = arith.constant 1.000000e+00 : f32
    %25 = vector.broadcast %cst_15 : f32 to vector<8x4xf32>
    %26 = arith.maximumf %25, %24 : vector<8x4xf32>
    %27 = vector.broadcast %cst_16 : f32 to vector<8x4xf32>
    %28 = arith.minimumf %27, %26 : vector<8x4xf32>
    %c0_17 = arith.constant 0 : index
    %c0_18 = arith.constant 0 : index
    %29 = vector.load %arg5[%c0_17, %c0_18] : memref<8x4xf32, #tpu.memory_space<vmem>>, vector<8x4xf32>
    tpu.vector_store %arg5[%c0_17, %c0_18], %28 {strides = array<i32>} : memref<8x4xf32, #tpu.memory_space<vmem>>, vector<8x4xf32>,
    return
  }
  func.func @transform_0(%arg0: i32) -> (i32, i32) {
    %c0_i32 = arith.constant 0 : i32
    %c0_i32_0 = arith.constant 0 : i32
    return %arg0, %c0_i32 : i32, i32
  }
  func.func @transform_1(%arg0: i32) -> (i32, i32) {
    %c0_i32 = arith.constant 0 : i32
    %c0_i32_0 = arith.constant 0 : i32
    %c0_i32_1 = arith.constant 0 : i32
    return %c0_i32, %c0_i32_0 : i32, i32
  }
  func.func @transform_2(%arg0: i32) -> (i32, i32) {
    %c0_i32 = arith.constant 0 : i32
    %c0_i32_0 = arith.constant 0 : i32
    %c0_i32_1 = arith.constant 0 : i32
    return %c0_i32, %c0_i32_0 : i32, i32
  }
  func.func @transform_3(%arg0: i32) -> (i32, i32) {
    %c0_i32 = arith.constant 0 : i32
    %c0_i32_0 = arith.constant 0 : i32
    return %arg0, %c0_i32 : i32, i32
  }
  func.func @transform_4(%arg0: i32) -> (i32, i32) {
    %c0_i32 = arith.constant 0 : i32
    %c0_i32_0 = arith.constant 0 : i32
    return %arg0, %c0_i32 : i32, i32
  }
}

</mosaic_0001>

<bundles_post_ra>
// kernel: tpu_custom_call.1
= control target key start
LH: loop header
LB: loop body
LE: loop exit
PB: predicated region body
PF: predicated region fallthrough
CT: control target
= control target key end

     0   :  { %10 = vsyncpa [#allocation3], 0  ;;  %s603_s0 = inlined_call_operand.hbm [shape: bf16[8,8], index: 0, kind: input, shape index: {}]   ;;  %s604_s1 = inlined_call_operand.hbm [shape: bf16[264,128], index: 1, kind: input, shape index: {}]   ;;  %s605_s2 = inlined_call_operand.vmem [shape: f32[1,384], index: 2, kind: input, shape index: {}]   ;;  %s606_s3 = inlined_call_operand.vmem [shape: f32[8,4], index: 3, kind: output, shape index: {0}]   ;;  %s607_s4 = inlined_call_operand.vmem [shape: f32[8,4], index: 4, kind: output, shape index: {1}]  }
   0x1   :  { %11 = vsyncpa [#allocation5], 0  ;;  %s502_s15 = smov [#allocation2]   ;;  %s503_s17 = smov [#allocation4]  }
   0x2   :  { %s18_s16 = sshll.u32 %s502_s15, 4  ;;  %s27_s18 = sshll.u32 %s503_s17, 4  ;;  %s19_s16 = int_to_ptr.vmem [resolvable:$true] %s18_s16  ;;  %s534_s18 = int_to_ptr.vmem [resolvable:$true] %s27_s18 }
   0x3   :  { %s454_s21 = scalar_lea.hbm %s603_s0, 64 }
   0x4   :  { %p455_p0 = scmp.ne.s32.totalorder %s603_s0, %s454_s21  ;;  %p458_p1 = scmp.lt.u32.totalorder %s454_s21, %s603_s0 }
   0x6   :  { %p460_p2 = pnand %p458_p1, %p455_p0 }
   0x8   :  { %463 = shalt.err (!%p460_p2)
}
   0x9   :  { %s464_s26 = scalar_lea.vmem %s19_s16, 64  ;;  %p469_p4 = scmp.lt.s32.totalorder %s19_s16, %s19_s16 }
   0xa   :  { %p465_p3 = scmp.ne.s32.totalorder %s19_s16, %s464_s26  ;;  %p470_p5 = scmp.lt.s32.totalorder %s464_s26, %s464_s26 }
   0xc   :  { %p471_p6 = por %p470_p5, %p469_p4 }
   0xe   :  { %p472_p7 = pnand %p471_p6, %p465_p3 }
  0x10   :  { %475 = shalt.err (!%p472_p7)
}
  0x11   :  { %21 = dma.hbm_to_vmem [thread:$0]  %s603_s0, 64, %s19_s16, [#allocation3]  }
  0x12   :  { %s476_s5 = scalar_lea.hbm %s604_s1, 2112 }
  0x13   :  { %p477_p8 = scmp.ne.s32.totalorder %s604_s1, %s476_s5  ;;  %p480_p9 = scmp.lt.u32.totalorder %s476_s5, %s604_s1 }
  0x15   :  { %p482_p10 = pnand %p480_p9, %p477_p8 }
  0x17   :  { %485 = shalt.err (!%p482_p10)
}
  0x18   :  { %s486_s10 = scalar_lea.vmem %s534_s18, 2112  ;;  %p491_p12 = scmp.lt.s32.totalorder %s534_s18, %s534_s18 }
  0x19   :  { %p487_p11 = scmp.ne.s32.totalorder %s534_s18, %s486_s10  ;;  %p492_p13 = scmp.lt.s32.totalorder %s486_s10, %s486_s10 }
  0x1b   :  { %p493_p0 = por %p492_p13, %p491_p12 }
  0x1d   :  { %p494_p1 = pnand %p493_p0, %p487_p11 }
  0x1f   :  { %497 = shalt.err (!%p494_p1)
}
  0x20   :  { %s504_s0 = smov 64   ;;  %s505_s11 = smov 4  }
  0x21   :  { %33 = dma.hbm_to_vmem [thread:$0]  %s604_s1, 2112, %s534_s18, [#allocation5], %s504_s0, %s504_s0, %s505_s11  }
  0x22   :  { %498 = dma.done.wait [#allocation3], 64  }
  0x23   :  { %499 = vsyncadd [#allocation3], 4294967232 }
  0x24   :  { %500 = dma.done.wait [#allocation5], 2112  }
  0x25   :  { %501 = vsyncadd [#allocation5], 4294965184  ;;  %v506_v0 = vmov 0.0   ;;  %vm507_vm0 = vmmov 0   ;;  %vm90_vm1 = vcmask 1043456   ;;  %vm86_vm2 = vcmask 64512  }
  0x26   :  { %385 = vmatprep.subr.bf16.mxu0 %v506_v0  ;;  %387 = vmatprep.mubr.msk.bf16.mxu0 %vm507_vm0, %v506_v0  ;;  %v44_v1 = vld [vmem:[#allocation4] sm:$0xf]  ;;  %v438_v3 = vld [vmem:[#allocation4 + $0x4] sm:$0xff]   ;;  %v43_v4 = vld [vmem:[#allocation2] sm:$0xf]  ;;  %vm326_vm3 = vcmask 31744  }
  0x27   :  { %391 = vmatprep.subr.bf16.mxu1 %v506_v0  ;;  %407 = vmatprep.mubr.msk.bf16.mxu1 %vm507_vm0, %v506_v0  ;;  %v92_v2 = vsel %vm90_vm1, %v44_v1, 0  ;;  %v439_v5 = vld [vmem:[#allocation4 + $0xc] sm:$0xff]   ;;  %v440_v6 = vld [vmem:[#allocation4 + $0x14] sm:$0xff]   ;;  %v441_v7 = vld [vmem:[#allocation4 + $0x1c] sm:$0xff]   ;;  %s508_s21 = smov 124  }
  0x28   :  { %386 = vmatpush3.bf16.msra.mxu0 %v92_v2  ;;  %392 = vmatpush3.bf16.msra.mxu1 %v438_v3  ;;  %v442_v8 = vld [vmem:[#allocation4 + $0x24] sm:$0xff]   ;;  %v443_v9 = vld [vmem:[#allocation4 + $0x2c] sm:$0xff]   ;;  %v444_v10 = vld [vmem:[#allocation4 + $0x34] sm:$0xff]  }
  0x29   :  { %411 = vmatprep.subr.bf16.mxu0 %v506_v0  ;;  %393 = vmatprep.subr.bf16.mxu1 %v506_v0  ;;  %v445_v11 = vld [vmem:[#allocation4 + $0x3c] sm:$0xff]   ;;  %v446_v12 = vld [vmem:[#allocation4 + $0x44] sm:$0xff]   ;;  %v447_v13 = vld [vmem:[#allocation4 + $0x4c] sm:$0xff]  }
  0x2a   :  { %v448_v14 = vld [vmem:[#allocation4 + $0x54] sm:$0xff]   ;;  %v449_v15 = vld [vmem:[#allocation4 + $0x5c] sm:$0xff]   ;;  %v450_v16 = vld [vmem:[#allocation4 + $0x64] sm:$0xff]  }
  0x2b   :  { %388 = vmatmul.mubr.msk.bf16.vlgmr.msra.gmra.mrb[0].mxu0 %vm86_vm2, %v43_v4  ;;  %v451_v17 = vld [vmem:[#allocation4 + $0x6c] sm:$0xff]   ;;  %v452_v26 = vld [vmem:[#allocation4 + $0x74] sm:$0xff]   ;;  %v453_v27 = vld [vmem:[#allocation4 + $0x7c] sm:$0xff]  }
  0x2c   :  { %427 = vmatprep.mubr.msk.bf16.mxu0 %vm507_vm0, %v506_v0  ;;  %394 = vmatpush3.bf16.msra.mxu1 %v439_v5  ;;  %v345_v18 = vld [vmem:[%s605_s2] ss:$0 sm:$0xff]  ;;  %v347_v28 = vld [vmem:[%s605_s2 + $0x1] ss:$0 sm:$0xff]  ;;  %v356_v36 = vld [vmem:[%s605_s2 + $0x2] ss:$0 sm:$0xff] }
  0x2d   :  { %395 = vmatprep.subr.bf16.mxu1 %v506_v0  ;;  %412 = vmatpush3.bf16.msra.mxu0 %v446_v12 }
  0x2e   :  { %413 = vmatprep.subr.bf16.mxu0 %v506_v0 }
  0x30   :  { %396 = vmatpush3.bf16.msra.mxu1 %v440_v6 }
  0x31   :  { %397 = vmatprep.subr.bf16.mxu1 %v506_v0  ;;  %414 = vmatpush3.bf16.msra.mxu0 %v447_v13 }
  0x32   :  { %415 = vmatprep.subr.bf16.mxu0 %v506_v0 }
  0x34   :  { %398 = vmatpush3.bf16.msra.mxu1 %v441_v7 }
  0x35   :  { %399 = vmatprep.subr.bf16.mxu1 %v506_v0  ;;  %416 = vmatpush3.bf16.msra.mxu0 %v448_v14 }
  0x36   :  { %417 = vmatprep.subr.bf16.mxu0 %v506_v0 }
  0x38   :  { %400 = vmatpush3.bf16.msra.mxu1 %v442_v8 }
  0x39   :  { %401 = vmatprep.subr.bf16.mxu1 %v506_v0  ;;  %418 = vmatpush3.bf16.msra.mxu0 %v449_v15 }
  0x3a   :  { %419 = vmatprep.subr.bf16.mxu0 %v506_v0 }
  0x3c   :  { %402 = vmatpush3.bf16.msra.mxu1 %v443_v9 }
  0x3d   :  { %403 = vmatprep.subr.bf16.mxu1 %v506_v0  ;;  %420 = vmatpush3.bf16.msra.mxu0 %v450_v16 }
  0x3e   :  { %421 = vmatprep.subr.bf16.mxu0 %v506_v0 }
  0x40   :  { %404 = vmatpush3.bf16.msra.mxu1 %v444_v10 }
  0x41   :  { %405 = vmatprep.subr.bf16.mxu1 %v506_v0  ;;  %422 = vmatpush3.bf16.msra.mxu0 %v451_v17 }
  0x42   :  { %423 = vmatprep.subr.bf16.mxu0 %v506_v0 }
  0x44   :  { %406 = vmatpush3.bf16.msra.mxu1 %v445_v11 }
  0x45   :  { %424 = vmatpush3.bf16.msra.mxu0 %v452_v26 }
  0x46   :  { %425 = vmatprep.subr.bf16.mxu0 %v506_v0 }
  0x49   :  { %426 = vmatpush3.bf16.msra.mxu0 %v453_v27 }
  0xfe   :  { %v128_v19 = vpop.f32.mrb[0].mxu0 }
  0xff   :  { %v129_v20 = vadd.f32 %v345_v18, %v128_v19  ;;  %v389_v21 = vpop.f32.mrb[1].mxu0 }
 0x100   :  { %v131_v22 = vpop.f32.mrb[2].mxu0 }
 0x101   :  { %v134_v23 = vmax.f32 %v129_v20, 0.0  ;;  %v390_v24 = vpop.f32.mrb[3].mxu0 }
 0x103   :  { %v135_v25 = vpack.c.bf16 %v134_v23, %v134_v23 }
 0x105   :  { %408 = vmatmul.mubr.bf16.vlgmr.msra.gmra.mrb[0].mxu1 %v135_v25 }
 0x1d8   :  { %v224_v29 = vpop.f32.mrb[0].mxu1 }
 0x1d9   :  { %v225_v30 = vadd.f32 %v347_v28, %v224_v29  ;;  %v409_v31 = vpop.f32.mrb[1].mxu1 }
 0x1da   :  { %v227_v32 = vpop.f32.mrb[2].mxu1 }
 0x1db   :  { %v230_v33 = vmax.f32 %v225_v30, 0.0  ;;  %v410_v34 = vpop.f32.mrb[3].mxu1 }
 0x1dd   :  { %v231_v35 = vpack.c.bf16 %v230_v33, %v230_v33 }
 0x1df   :  { %428 = vmatmul.mubr.bf16.vlgmr.msra.gmra.mrb[4].mxu0 %v231_v35 }
 0x2b2   :  { %v320_v37 = vpop.f32.mrb[4].mxu0 }
 0x2b3   :  { %v321_v38 = vadd.f32 %v356_v36, %v320_v37  ;;  %v429_v39 = vpop.f32.mrb[5].mxu0 }
 0x2b4   :  { %v323_v40 = vpop.f32.mrb[6].mxu0 }
 0x2b5   :  { %v430_v41 = vpop.f32.mrb[7].mxu0  ;;  %v328_v42 = vmax.f32 %v321_v38, 1e-06  ;;  %327 = vst.msk [vmem:[%s606_s3] sm:$0xff] %vm326_vm3, %v321_v38 }
 0x2b7   :  { %v329_v43 = vmin.f32 %v328_v42, 1.0 }
 0x2b9   :  { %331 = vrot.lane.b32.xlu0 %v329_v43, %s508_s21 }
 0x32b   :  { %v332_v44 = vpop.permute.xlu0 %331 }
 0x32c   :  { %334 = vst.msk [vmem:[%s607_s4] sm:$0xff] %vm326_vm3, %v332_v44 }
 0x32d   :  { %343 = vsyncpa [#allocation3], 1 }
 0x32e   :  { %344 = vsyncpa [#allocation5], 1 }

</bundles_post_ra>
